<compile_context>
chip_gen: v7x
topology: tpu7x:2x2x1
jax: 0.10.0
libtpu: 0.0.40
codegen_flags: <defaults>
</compile_context>

<pallas_src>
import math

import jax
import jax.numpy as jnp
from jax import lax
from jax.experimental import pallas as pl
from jax.experimental.pallas import tpu as pltpu

N_EMBD = 128
N_HEAD = 4
HEAD_DIM = N_EMBD // N_HEAD

_CONTRACT_LAST = (((1,), (1,)), ((), ()))  # contract last dim of both operands (q @ k^T, no transpose)


# --------------------------- kernel A: fused QKV projection ---------------------------
def _qkv_proj_kernel(x_ref, w_ref, b_ref, qkv_ref):
    # x: (TR, C) bf16, w: (C, 3C) bf16 (= [Wq_scaled.T | Wk.T | Wv.T]), b: (1, 3C) f32
    qkv = jnp.dot(x_ref[...], w_ref[...], preferred_element_type=jnp.float32) + b_ref[...]
    qkv_ref[...] = qkv.astype(qkv_ref.dtype)                 # one lane-dense (TR, 384) store


# ---------------- kernel B: group-masked attention + fused output projection ----------
def _attn_kernel(idx_q_ref, idx_kv_ref, q_ref, k_ref, v_ref, wp_ref, bp_ref, o_ref):
    # idx_q: (TQ, 1) int32 (query tile), idx_kv: (1, N) int32 (all rows)
    mask = idx_q_ref[...] == idx_kv_ref[...]                 # (TQ, N) group mask
    tq = q_ref.shape[0]
    neg_big = jnp.float32(-1e30)

    acc = jnp.zeros((tq, wp_ref.shape[1]), jnp.float32)      # fused output-projection accumulator
    for h in range(N_HEAD):                                  # static unroll (N_HEAD = 4)
        sl = slice(h * HEAD_DIM, (h + 1) * HEAD_DIM)
        qh = q_ref[:, sl]                                    # (TQ, 32) bf16, attn scale folded in
        kh = k_ref[:, sl]                                    # (N, 32)  bf16
        # scores: contraction on last dims of both -> no XLU transpose of kh
        s = lax.dot_general(qh, kh, dimension_numbers=_CONTRACT_LAST,
                            preferred_element_type=jnp.float32)          # (TQ, N) f32
        s = jnp.where(mask, s, neg_big)
        s = s - jnp.max(s, axis=-1, keepdims=True)
        p = jnp.exp(s)
        inv_l = pl.reciprocal(jnp.sum(p, axis=-1, keepdims=True), approx=True)  # (TQ, 1)
        oh = jnp.dot(p.astype(jnp.bfloat16), v_ref[:, sl],
                     preferred_element_type=jnp.float32) * inv_l                # (TQ, 32)
        # fold output projection: y @ Wp.T == sum_h oh @ Wp.T[h*32:(h+1)*32, :]
        acc = acc + jnp.dot(oh.astype(jnp.bfloat16), wp_ref[sl, :],
                            preferred_element_type=jnp.float32)
    o_ref[...] = (acc + bp_ref[...]).astype(o_ref.dtype)     # lane-dense (TQ, 128) store


# ------------------------------------ wrapper -----------------------------------------
def _largest_tile(n, cap):
    """Largest multiple-of-8 divisor of n that is <= cap (or n itself if n <= cap / n not /8)."""
    if n <= cap or n % 8 != 0:
        return n
    best = 8
    t = 8
    while t <= cap:
        if n % t == 0:
            best = t
        t += 8
    return best


def prepare_params(params):
    """Fuse + cast the PyTorch-layout attention weights once (reuse across calls)."""
    scale = 1.0 / math.sqrt(HEAD_DIM)
    w_qkv = jnp.concatenate(
        [(params["Wq"] * scale).T, params["Wk"].T, params["Wv"].T], axis=1
    ).astype(jnp.bfloat16)                                               # (C, 3C), scale folded into Wq
    b_qkv = jnp.concatenate(
        [params["bq"] * scale, params["bk"], params["bv"]]
    ).reshape(1, -1).astype(jnp.float32)                                 # (1, 3C)
    wp_t = params["Wp"].T.astype(jnp.bfloat16)                           # (C, C)
    bp = params["bp"].reshape(1, -1).astype(jnp.float32)                 # (1, C)
    return {"w_qkv": w_qkv, "b_qkv": b_qkv, "wp_t": wp_t, "bp": bp}


def transformer_pool(x, index, prepped, *, tile_q=128, tile_rows=512):
    """x: (N, C) float32, index: (N,) int group ids, prepped: output of prepare_params()."""
    n, c = x.shape
    assert c == N_EMBD
    tq = _largest_tile(n, tile_q)     # query tile (MXU M fill); on v7x keep n//tq >= 2+ when possible
    tr = _largest_tile(n, tile_rows)  # QKV-projection row tile, decoupled & larger than tq

    x_bf = x.astype(jnp.bfloat16)
    cparams = pltpu.CompilerParams(
        dimension_semantics=("parallel",),
        vmem_limit_bytes=64 * 1024 * 1024,
    )

    # ---- kernel A: fused QKV projection -> single (N, 3C) bf16 array ----
    qkv = pl.pallas_call(
        _qkv_proj_kernel,
        out_shape=jax.ShapeDtypeStruct((n, 3 * c), jnp.bfloat16),
        grid=(n // tr,),
        in_specs=[
            pl.BlockSpec((tr, c), lambda i: (i, 0)),
            pl.BlockSpec((c, 3 * c), lambda i: (0, 0)),
            pl.BlockSpec((1, 3 * c), lambda i: (0, 0)),
        ],
        out_specs=pl.BlockSpec((tr, 3 * c), lambda i: (i, 0)),
        compiler_params=cparams,
    )(x_bf, prepped["w_qkv"], prepped["b_qkv"])

    # ---- kernel B: masked attention + fused output projection, gridded over query tiles ----
    idx_col = index.reshape(n, 1).astype(jnp.int32)
    idx_row = index.reshape(1, n).astype(jnp.int32)

    out = pl.pallas_call(
        _attn_kernel,
        out_shape=jax.ShapeDtypeStruct((n, c), x.dtype),
        grid=(n // tq,),
        in_specs=[
            pl.BlockSpec((tq, 1), lambda i: (i, 0)),     # query-tile group ids
            pl.BlockSpec((1, n), lambda i: (0, 0)),      # all group ids (resident)
            pl.BlockSpec((tq, c), lambda i: (i, 0)),     # Q tile      (cols [0, C)   of qkv)
            pl.BlockSpec((n, c), lambda i: (0, 1)),      # K, resident (cols [C, 2C)  of qkv)
            pl.BlockSpec((n, c), lambda i: (0, 2)),      # V, resident (cols [2C, 3C) of qkv)
            pl.BlockSpec((c, c), lambda i: (0, 0)),      # Wp.T (resident)
            pl.BlockSpec((1, c), lambda i: (0, 0)),      # bp (resident)
        ],
        out_specs=pl.BlockSpec((tq, c), lambda i: (i, 0)),
        compiler_params=cparams,
    )(idx_col, idx_row, qkv, qkv, qkv, prepped["wp_t"], prepped["bp"])
    return out


# ---------------- pure-JAX reference (mirrors the PyTorch code path, f32) --------------
def _self_attention_ref(xg, p):
    T, C = xg.shape
    q = (xg @ p["Wq"].T + p["bq"]).reshape(T, N_HEAD, HEAD_DIM).transpose(1, 0, 2)
    k = (xg @ p["Wk"].T + p["bk"]).reshape(T, N_HEAD, HEAD_DIM).transpose(1, 0, 2)
    v = (xg @ p["Wv"].T + p["bv"]).reshape(T, N_HEAD, HEAD_DIM).transpose(1, 0, 2)
    att = (q @ k.transpose(0, 2, 1)) * (1.0 / math.sqrt(HEAD_DIM))
    att = jax.nn.softmax(att, axis=-1)
    y = (att @ v).transpose(1, 0, 2).reshape(T, C)
    return y @ p["Wp"].T + p["bp"]


def _transformer_pool_ref(x, index, p):
    import numpy as np
    index_np = np.asarray(index)
    out = np.zeros(np.asarray(x).shape, dtype=np.float32)
    for g in np.unique(index_np):
        rows = np.where(index_np == g)[0]
        out[rows] = np.asarray(_self_attention_ref(x[rows], p))
    return jnp.asarray(out)


if __name__ == "__main__":
    key = jax.random.PRNGKey(0)
    k_x, k_idx, kq, kk, kv, kp = jax.random.split(key, 6)

    N = 64                                   # tokens (rows), 4 pooling groups
    x = jax.random.normal(k_x, (N, N_EMBD), dtype=jnp.float32)
    index = jax.random.randint(k_idx, (N,), 0, 4, dtype=jnp.int32)

    w_scale = 1.0 / math.sqrt(N_EMBD)
    params = {
        "Wq": jax.random.normal(kq, (N_EMBD, N_EMBD), jnp.float32) * w_scale,
        "bq": jnp.linspace(-0.1, 0.1, N_EMBD, dtype=jnp.float32),
        "Wk": jax.random.normal(kk, (N_EMBD, N_EMBD), jnp.float32) * w_scale,
        "bk": jnp.linspace(0.1, -0.1, N_EMBD, dtype=jnp.float32),
        "Wv": jax.random.normal(kv, (N_EMBD, N_EMBD), jnp.float32) * w_scale,
        "bv": jnp.zeros((N_EMBD,), jnp.float32),
        "Wp": jax.random.normal(kp, (N_EMBD, N_EMBD), jnp.float32) * w_scale,
        "bp": jnp.full((N_EMBD,), 0.01, jnp.float32),
    }

    prepped = prepare_params(params)         # weight fusion hoisted out of the call path
    out = jax.block_until_ready(transformer_pool(x, index, prepped))

    ref = _transformer_pool_ref(x, index, params)
    # bf16 MXU operands + approx softmax reciprocal -> looser tolerance than pure-f32.
    assert jnp.allclose(out, ref, atol=5e-2, rtol=5e-2), "mismatch vs reference"

    print("KERNEL_OK")
</pallas_src>

<mosaic_0001>
module attributes {stable_mosaic.version = 11 : i64} {
  func.func @_qkv_proj_kernel(%arg0: i32, %arg1: memref<64x128xbf16, #tpu.memory_space<vmem>>, %arg2: memref<128x384xbf16, #tpu.memory_space<vmem>>, %arg3: memref<1x384xf32, #tpu.memory_space<vmem>>, %arg4: memref<64x384xbf16, #tpu.memory_space<vmem>>) attributes {dimension_semantics = [#tpu.dimension_semantics<parallel>], iteration_bounds = array<i64: 1>, scalar_prefetch = 0 : i64, scratch_operands = 0 : i64, tpu.core_type = #tpu.core_type<tc>, window_params = [{transform_indices = @transform_0, window_bounds = array<i64: 64, 128>}, {pipeline_mode = #tpu.pipeline_mode<synchronous>, transform_indices = @transform_1, window_bounds = array<i64: 128, 384>}, {pipeline_mode = #tpu.pipeline_mode<synchronous>, transform_indices = @transform_2, window_bounds = array<i64: 1, 384>}, {transform_indices = @transform_3, window_bounds = array<i64: 64, 384>}]} {
    %c0 = arith.constant 0 : index
    %c0_0 = arith.constant 0 : index
    %0 = vector.load %arg1[%c0, %c0_0] : memref<64x128xbf16, #tpu.memory_space<vmem>>, vector<64x128xbf16>
    %c0_1 = arith.constant 0 : index
    %c0_2 = arith.constant 0 : index
    %1 = vector.load %arg2[%c0_1, %c0_2] : memref<128x384xbf16, #tpu.memory_space<vmem>>, vector<128x384xbf16>
    %cst = arith.constant dense<0.000000e+00> : vector<64x384xf32>
    %2 = tpu.matmul %0, %1, %cst {dimension_numbers = #tpu.dot_dimension_numbers<[1], [0], [0], [1], [0, 0, 1, 1], [], []>} : vector<64x128xbf16>, vector<128x384xbf16>, vector<64x384xf32> -> vector<64x384xf32>
    %c0_3 = arith.constant 0 : index
    %c0_4 = arith.constant 0 : index
    %3 = vector.load %arg3[%c0_3, %c0_4] : memref<1x384xf32, #tpu.memory_space<vmem>>, vector<1x384xf32>
    %4 = vector.broadcast %3 : vector<1x384xf32> to vector<64x384xf32>
    %5 = arith.addf %2, %4 : vector<64x384xf32>
    %6 = arith.truncf %5 : vector<64x384xf32> to vector<64x384xbf16>
    %c0_5 = arith.constant 0 : index
    %c0_6 = arith.constant 0 : index
    %7 = vector.load %arg4[%c0_5, %c0_6] : memref<64x384xbf16, #tpu.memory_space<vmem>>, vector<64x384xbf16>
    tpu.vector_store %arg4[%c0_5, %c0_6], %6 {strides = array<i32>} : memref<64x384xbf16, #tpu.memory_space<vmem>>, vector<64x384xbf16>,
    return
  }
  func.func @transform_0(%arg0: i32) -> (i32, i32) {
    %c0_i32 = arith.constant 0 : i32
    %c0_i32_0 = arith.constant 0 : i32
    return %arg0, %c0_i32 : i32, i32
  }
  func.func @transform_1(%arg0: i32) -> (i32, i32) {
    %c0_i32 = arith.constant 0 : i32
    %c0_i32_0 = arith.constant 0 : i32
    %c0_i32_1 = arith.constant 0 : i32
    return %c0_i32, %c0_i32_0 : i32, i32
  }
  func.func @transform_2(%arg0: i32) -> (i32, i32) {
    %c0_i32 = arith.constant 0 : i32
    %c0_i32_0 = arith.constant 0 : i32
    %c0_i32_1 = arith.constant 0 : i32
    return %c0_i32, %c0_i32_0 : i32, i32
  }
  func.func @transform_3(%arg0: i32) -> (i32, i32) {
    %c0_i32 = arith.constant 0 : i32
    %c0_i32_0 = arith.constant 0 : i32
    return %arg0, %c0_i32 : i32, i32
  }
}

</mosaic_0001>

<bundles_post_ra>
// kernel: tpu_custom_call.1
= control target key start
LH: loop header
LB: loop body
LE: loop exit
PB: predicated region body
PF: predicated region fallthrough
CT: control target
= control target key end

     0   :  { %8 = vsyncpa [#allocation3], 0  ;;  %s858_s0 = inlined_call_operand.hbm [shape: bf16[64,128], index: 0, kind: input, shape index: {}]   ;;  %s859_s1 = inlined_call_operand.hbm [shape: bf16[128,384], index: 1, kind: input, shape index: {}]   ;;  %s860_s2 = inlined_call_operand.hbm [shape: f32[1,384], index: 2, kind: input, shape index: {}]   ;;  %s861_s3 = inlined_call_operand.hbm [shape: bf16[64,384], index: 3, kind: output, shape index: {}]  }
   0x1   :  { %9 = vsyncpa [#allocation6], 0 }
   0x2   :  { %10 = vsyncpa [#allocation4], 0  ;;  %s751_s12 = smov [#allocation5]   ;;  %s657_s16 = scalar_lea.hbm %s859_s1, 3072 }
   0x3   :  { %s28_s13 = sshll.u32 %s751_s12, 4  ;;  %p658_p0 = scmp.ne.s32.totalorder %s859_s1, %s657_s16  ;;  %s29_s13 = int_to_ptr.vmem [resolvable:$true] %s28_s13 }
   0x4   :  { %p661_p1 = scmp.lt.u32.totalorder %s657_s16, %s859_s1 }
   0x6   :  { %p663_p2 = pnand %p661_p1, %p658_p0 }
   0x8   :  { %666 = shalt.err (!%p663_p2)
}
   0x9   :  { %s667_s21 = scalar_lea.vmem %s29_s13, 3072  ;;  %p672_p4 = scmp.lt.s32.totalorder %s29_s13, %s29_s13 }
   0xa   :  { %p668_p3 = scmp.ne.s32.totalorder %s29_s13, %s667_s21  ;;  %p673_p5 = scmp.lt.s32.totalorder %s667_s21, %s667_s21 }
   0xc   :  { %p674_p6 = por %p673_p5, %p672_p4 }
   0xe   :  { %p675_p7 = pnand %p674_p6, %p668_p3 }
  0x10   :  { %678 = shalt.err (!%p675_p7)
}
  0x11   :  { %s752_s22 = smov 192   ;;  %s753_s23 = smov 12  }
  0x12   :  { %34 = dma.hbm_to_vmem [thread:$0]  %s859_s1, 3072, %s29_s13, [#allocation6], %s752_s22, %s752_s22, %s753_s23  }
  0x13   :  { %s754_s26 = smov [#allocation2]   ;;  %s679_s30 = scalar_lea.hbm %s858_s0, 512 }
  0x14   :  { %s16_s27 = sshll.u32 %s754_s26, 4  ;;  %p680_p8 = scmp.ne.s32.totalorder %s858_s0, %s679_s30  ;;  %s17_s27 = int_to_ptr.vmem [resolvable:$true] %s16_s27 }
  0x15   :  { %p683_p9 = scmp.lt.u32.totalorder %s679_s30, %s858_s0 }
  0x17   :  { %p685_p10 = pnand %p683_p9, %p680_p8 }
  0x19   :  { %688 = shalt.err (!%p685_p10)
}
  0x1a   :  { %s689_s8 = scalar_lea.vmem %s17_s27, 512  ;;  %p694_p12 = scmp.lt.s32.totalorder %s17_s27, %s17_s27 }
  0x1b   :  { %p690_p11 = scmp.ne.s32.totalorder %s17_s27, %s689_s8  ;;  %p695_p13 = scmp.lt.s32.totalorder %s689_s8, %s689_s8 }
  0x1d   :  { %p696_p0 = por %p695_p13, %p694_p12 }
  0x1f   :  { %p697_p1 = pnand %p696_p0, %p690_p11 }
  0x21   :  { %700 = shalt.err (!%p697_p1)
}
  0x22   :  { %s755_s1 = smov 64   ;;  %s756_s9 = smov 4  }
  0x23   :  { %22 = dma.hbm_to_vmem [thread:$0]  %s858_s0, 512, %s17_s27, [#allocation3], %s755_s1, %s755_s1, %s756_s9  }
  0x24   :  { %s757_s12 = smov [#allocation7]   ;;  %s701_s16 = scalar_lea.hbm %s860_s2, 48 }
  0x25   :  { %s41_s13 = sshll.u32 %s757_s12, 4  ;;  %p702_p2 = scmp.ne.s32.totalorder %s860_s2, %s701_s16  ;;  %s42_s13 = int_to_ptr.vmem [resolvable:$true] %s41_s13 }
  0x26   :  { %p705_p3 = scmp.lt.u32.totalorder %s701_s16, %s860_s2 }
  0x28   :  { %p707_p4 = pnand %p705_p3, %p702_p2 }
  0x2a   :  { %710 = shalt.err (!%p707_p4)
}
  0x2b   :  { %s711_s21 = scalar_lea.vmem %s42_s13, 48  ;;  %s715_s0 = scalar_lea.vmem %s42_s13, 64 }
  0x2c   :  { %p712_p5 = scmp.ne.s32.totalorder %s42_s13, %s711_s21  ;;  %p716_p6 = scmp.lt.s32.totalorder %s42_s13, %s42_s13 }
  0x2d   :  { %p717_p7 = scmp.lt.s32.totalorder %s715_s0, %s711_s21 }
  0x2f   :  { %p718_p8 = por %p717_p7, %p716_p6 }
  0x31   :  { %p719_p9 = pnand %p718_p8, %p712_p5 }
  0x33   :  { %722 = shalt.err (!%p719_p9)
}
  0x34   :  { %44 = dma.hbm_to_vmem [thread:$0]  %s860_s2, 48, %s42_s13, [#allocation6]  }
  0x35   :  { %745 = dma.done.wait [#allocation3], 512  }
  0x36   :  { %746 = vsyncadd [#allocation3], 4294966784 }
  0x37   :  { %747 = dma.done.wait [#allocation6], 3120  }
  0x38   :  { %748 = vsyncadd [#allocation6], 4294964176  ;;  %v758_v0 = vmov 0   ;;  %v621_v1 = vld [vmem:[#allocation5 + $0x4] ss:$12 sps:$4 sm:$0xff]   ;;  %v653_v26 = vld [vmem:[#allocation2 + $0x8] sm:$0xff]   ;;  %v97_v29 = vlaneseq }
  0x39   :  { %296 = vmatprep.mubr.bf16.mxu0 %v758_v0  ;;  %v623_v2 = vld [vmem:[#allocation5] ss:$12 sps:$4 sm:$0xff]   ;;  %264 = vmatprep.subr.bf16.mxu0 %v621_v1  ;;  %v624_v3 = vld [vmem:[#allocation5 + $0x1c] ss:$12 sps:$4 sm:$0xff]   ;;  %v626_v4 = vld [vmem:[#allocation5 + $0x18] ss:$12 sps:$4 sm:$0xff]  }
  0x3a   :  { %265 = vmatpush1.bf16.msra.mxu0 %v623_v2  ;;  %v627_v5 = vld [vmem:[#allocation5 + $0x34] ss:$12 sps:$4 sm:$0xff]   ;;  %v629_v7 = vld [vmem:[#allocation5 + $0x30] ss:$12 sps:$4 sm:$0xff]   ;;  %v630_v8 = vld [vmem:[#allocation5 + $0x4c] ss:$12 sps:$4 sm:$0xff]  }
  0x3b   :  { %266 = vmatprep.subr.bf16.mxu0 %v624_v3  ;;  %v633_v6 = vld [vmem:[#allocation5 + $0x8] ss:$12 sps:$4 sm:$0xff]   ;;  %v637_v9 = vld [vmem:[#allocation5 + $0x20] ss:$12 sps:$4 sm:$0xff]   ;;  %v641_v10 = vld [vmem:[#allocation5 + $0x38] ss:$12 sps:$4 sm:$0xff]  }
  0x3c   :  { %588 = vmatprep.subr.bf16.mxu1 %v633_v6  ;;  %v632_v11 = vld [vmem:[#allocation5 + $0x48] ss:$12 sps:$4 sm:$0xff]   ;;  %v634_v12 = vld [vmem:[#allocation5 + $0x64] ss:$12 sps:$4 sm:$0xff]   ;;  %v636_v13 = vld [vmem:[#allocation5 + $0x60] ss:$12 sps:$4 sm:$0xff]  }
  0x3d   :  { %589 = vmatpush3.bf16.msra.mxu1 %v633_v6  ;;  %v645_v14 = vld [vmem:[#allocation5 + $0x50] ss:$12 sps:$4 sm:$0xff]   ;;  %v650_v16 = vld [vmem:[#allocation2] sm:$0xff]   ;;  %v649_v17 = vld [vmem:[#allocation5 + $0x68] ss:$12 sps:$4 sm:$0xff]   ;;  %v98_v30 = vshrl.u32 %v97_v29, 7 }
  0x3e   :  { %267 = vmatpush1.bf16.msra.mxu0 %v626_v4  ;;  %590 = vmatprep.subr.bf16.mxu1 %v637_v9  ;;  %v638_v15 = vld [vmem:[#allocation5 + $0x7c] ss:$12 sps:$4 sm:$0xff]   ;;  %v640_v18 = vld [vmem:[#allocation5 + $0x78] ss:$12 sps:$4 sm:$0xff]   ;;  %v642_v19 = vld [vmem:[#allocation5 + $0x94] ss:$12 sps:$4 sm:$0xff]  }
  0x3f   :  { %268 = vmatprep.subr.bf16.mxu0 %v627_v5  ;;  %604 = vmatprep.mubr.bf16.mxu1 %v650_v16  ;;  %v651_v20 = vld [vmem:[#allocation5 + $0x80] ss:$12 sps:$4 sm:$0xff]   ;;  %v644_v21 = vld [vmem:[#allocation5 + $0x90] ss:$12 sps:$4 sm:$0xff]   ;;  %v652_v23 = vld [vmem:[#allocation5 + $0x98] ss:$12 sps:$4 sm:$0xff]  }
  0x40   :  { %v646_v22 = vld [vmem:[#allocation5 + $0xac] ss:$12 sps:$4 sm:$0xff]   ;;  %v648_v24 = vld [vmem:[#allocation5 + $0xa8] ss:$12 sps:$4 sm:$0xff]   ;;  %v654_v25 = vld [vmem:[#allocation5 + $0xb0] ss:$12 sps:$4 sm:$0xff]  }
  0x41   :  { %591 = vmatpush3.bf16.msra.mxu1 %v637_v9  ;;  %v655_v27 = vld [vmem:[#allocation2 + $0x10] sm:$0xff]   ;;  %v656_v28 = vld [vmem:[#allocation2 + $0x18] sm:$0xff]   ;;  %v99_v31 = vsub.s32 0, %v98_v30  ;;  %v95_v32 = vld [vmem:[#allocation7] sm:$0x7]  ;;  %v103_v33 = vsub.s32 1, %v98_v30 }
  0x42   :  { %269 = vmatpush1.bf16.msra.mxu0 %v629_v7  ;;  %592 = vmatprep.subr.bf16.mxu1 %v641_v10  ;;  %v107_v36 = vsub.s32 2, %v98_v30  ;;  %s759_s2 = smov [#allocation8]  }
  0x43   :  { %270 = vmatprep.subr.bf16.mxu0 %v630_v8  ;;  %v823_v34 = vrot.slane %v95_v32, %v99_v31  ;;  %v825_v35 = vrot.slane %v95_v32, %v103_v33  ;;  %s503_s26 = sshll.u32 %s759_s2, 4  ;;  %s504_s26 = int_to_ptr.vmem [resolvable:$true] %s503_s26 }
  0x44   :  { %v108_v44 = vrot.slane %v95_v32, %v107_v36  ;;  %s723_s27 = scalar_lea.vmem %s504_s26, 1536  ;;  %p728_p11 = scmp.lt.s32.totalorder %s504_s26, %s504_s26 }
  0x45   :  { %593 = vmatpush3.bf16.msra.mxu1 %v641_v10  ;;  %p724_p10 = scmp.ne.s32.totalorder %s504_s26, %s723_s27  ;;  %p729_p12 = scmp.lt.s32.totalorder %s723_s27, %s723_s27 }
  0x46   :  { %271 = vmatpush1.bf16.msra.mxu0 %v632_v11  ;;  %594 = vmatprep.subr.bf16.mxu1 %v645_v14 }
  0x47   :  { %272 = vmatprep.subr.bf16.mxu0 %v634_v12  ;;  %p730_p13 = por %p729_p12, %p728_p11 }
  0x49   :  { %595 = vmatpush3.bf16.msra.mxu1 %v645_v14  ;;  %p731_p0 = pnand %p730_p13, %p724_p10 }
  0x4a   :  { %273 = vmatpush1.bf16.msra.mxu0 %v636_v13  ;;  %596 = vmatprep.subr.bf16.mxu1 %v649_v17 }
  0x4b   :  { %274 = vmatprep.subr.bf16.mxu0 %v638_v15 }
  0x4d   :  { %597 = vmatpush3.bf16.msra.mxu1 %v649_v17 }
  0x4e   :  { %275 = vmatpush1.bf16.msra.mxu0 %v640_v18  ;;  %598 = vmatprep.subr.bf16.mxu1 %v651_v20 }
  0x4f   :  { %276 = vmatprep.subr.bf16.mxu0 %v642_v19 }
  0x51   :  { %599 = vmatpush3.bf16.msra.mxu1 %v651_v20 }
  0x52   :  { %277 = vmatpush1.bf16.msra.mxu0 %v644_v21  ;;  %600 = vmatprep.subr.bf16.mxu1 %v652_v23 }
  0x53   :  { %278 = vmatprep.subr.bf16.mxu0 %v646_v22 }
  0x55   :  { %601 = vmatpush3.bf16.msra.mxu1 %v652_v23 }
  0x56   :  { %279 = vmatpush1.bf16.msra.mxu0 %v648_v24  ;;  %602 = vmatprep.subr.bf16.mxu1 %v654_v25 }
  0x59   :  { %297 = vmatmul.mubr.bf16.vlgmr.msra.gmra.mrb[0].mxu0 %v650_v16  ;;  %603 = vmatpush3.bf16.msra.mxu1 %v654_v25 }
  0x5a   :  { %306 = vmatprep.mubr.bf16.mxu0 %v758_v0 }
  0x5c   :  { %605 = vmatmul.mubr.bf16.vlgmr.msra.gmra.mrb[0].mxu1 %v653_v26 }
  0x5d   :  { %608 = vmatprep.mubr.bf16.mxu1 %v655_v27 }
  0x61   :  { %307 = vmatmul.mubr.bf16.gmra.mrb[4].mxu0 %v653_v26 }
  0x62   :  { %316 = vmatprep.mubr.bf16.mxu0 %v758_v0 }
  0x64   :  { %609 = vmatmul.mubr.bf16.gmra.mrb[4].mxu1 %v656_v28 }
  0x69   :  { %317 = vmatmul.mubr.bf16.gmra.mrb[8].mxu0 %v655_v27 }
  0x6a   :  { %326 = vmatprep.mubr.bf16.mxu0 %v758_v0 }
  0x71   :  { %327 = vmatmul.mubr.bf16.gmra.mrb[12].mxu0 %v656_v28 }
 0x12c   :  { %v298_v37 = vpop.f32.mrb[0].mxu0 }
 0x12d   :  { %v299_v38 = vadd.f32 %v298_v37, %v823_v34  ;;  %v300_v39 = vpop.f32.mrb[1].mxu0 }
 0x12e   :  { %v301_v40 = vadd.f32 %v300_v39, %v825_v35  ;;  %v302_v41 = vpop.f32.mrb[2].mxu0 }
 0x12f   :  { %v303_v42 = vadd.f32 %v302_v41, %v823_v34  ;;  %v304_v43 = vpop.f32.mrb[3].mxu0  ;;  %v606_v48 = vpop.f32.mrb[0].mxu1 }
 0x130   :  { %v560_v45 = vpack.c.bf16 %v301_v40, %v299_v38  ;;  %v305_v46 = vadd.f32 %v304_v43, %v825_v35  ;;  %v380_v49 = vadd.f32 %v606_v48, %v108_v44  ;;  %v371_v50 = vpop.f32.mrb[1].mxu1 }
 0x131   :  { %v372_v52 = vadd.f32 %v371_v50, %v108_v44  ;;  %v607_v53 = vpop.f32.mrb[2].mxu1 }
 0x132   :  { %482 = vst [vmem:[#allocation8] sm:$0xff] %v560_v45  ;;  %v562_v47 = vpack.c.bf16 %v305_v46, %v303_v42  ;;  %v565_v56 = vpack.c.bf16 %v380_v49, %v380_v49  ;;  %v383_v57 = vadd.f32 %v607_v53, %v108_v44  ;;  %v374_v58 = vpop.f32.mrb[3].mxu1 }
 0x133   :  { %v561_v61 = vpack.c.bf16 %v372_v52, %v372_v52  ;;  %v375_v62 = vadd.f32 %v374_v58, %v108_v44 }
 0x134   :  { %484 = vst [vmem:[#allocation8 + $0xc] sm:$0xff] %v562_v47  ;;  %v308_v51 = vpop.f32.mrb[4].mxu0  ;;  %487 = vst [vmem:[#allocation8 + $0x20] sm:$0xf] %v565_v56  ;;  %v567_v1 = vpack.c.bf16 %v383_v57, %v383_v57 }
 0x135   :  { %v309_v54 = vadd.f32 %v308_v51, %v823_v34  ;;  %v310_v55 = vpop.f32.mrb[5].mxu0  ;;  %483 = vst [vmem:[#allocation8 + $0x8] sm:$0xf] %v561_v61  ;;  %v563_v4 = vpack.c.bf16 %v375_v62, %v375_v62 }
 0x136   :  { %v311_v59 = vadd.f32 %v310_v55, %v825_v35  ;;  %v312_v60 = vpop.f32.mrb[6].mxu0  ;;  %489 = vst [vmem:[#allocation8 + $0x2c] sm:$0xf] %v567_v1 }
 0x137   :  { %v313_v63 = vadd.f32 %v312_v60, %v823_v34  ;;  %v314_v0 = vpop.f32.mrb[7].mxu0  ;;  %485 = vst [vmem:[#allocation8 + $0x14] sm:$0xf] %v563_v4  ;;  %v610_v6 = vpop.f32.mrb[4].mxu1 }
 0x138   :  { %v564_v2 = vpack.c.bf16 %v311_v59, %v309_v54  ;;  %v315_v3 = vadd.f32 %v314_v0, %v825_v35  ;;  %v396_v7 = vadd.f32 %v610_v6, %v108_v44  ;;  %v387_v8 = vpop.f32.mrb[5].mxu1 }
 0x139   :  { %v388_v10 = vadd.f32 %v387_v8, %v108_v44  ;;  %v611_v11 = vpop.f32.mrb[6].mxu1 }
 0x13a   :  { %486 = vst [vmem:[#allocation8 + $0x18] sm:$0xff] %v564_v2  ;;  %v566_v5 = vpack.c.bf16 %v315_v3, %v313_v63  ;;  %v573_v14 = vpack.c.bf16 %v396_v7, %v396_v7  ;;  %v399_v15 = vadd.f32 %v611_v11, %v108_v44  ;;  %v390_v16 = vpop.f32.mrb[7].mxu1 }
 0x13b   :  { %v569_v19 = vpack.c.bf16 %v388_v10, %v388_v10  ;;  %v391_v20 = vadd.f32 %v390_v16, %v108_v44 }
 0x13c   :  { %488 = vst [vmem:[#allocation8 + $0x24] sm:$0xff] %v566_v5  ;;  %v318_v9 = vpop.f32.mrb[8].mxu0  ;;  %495 = vst [vmem:[#allocation8 + $0x50] sm:$0xf] %v573_v14  ;;  %v575_v23 = vpack.c.bf16 %v399_v15, %v399_v15 }
 0x13d   :  { %v319_v12 = vadd.f32 %v318_v9, %v823_v34  ;;  %v320_v13 = vpop.f32.mrb[9].mxu0  ;;  %491 = vst [vmem:[#allocation8 + $0x38] sm:$0xf] %v569_v19  ;;  %v571_v26 = vpack.c.bf16 %v391_v20, %v391_v20 }
 0x13e   :  { %v321_v17 = vadd.f32 %v320_v13, %v825_v35  ;;  %v322_v18 = vpop.f32.mrb[10].mxu0  ;;  %497 = vst [vmem:[#allocation8 + $0x5c] sm:$0xf] %v575_v23 }
 0x13f   :  { %v323_v21 = vadd.f32 %v322_v18, %v823_v34  ;;  %v324_v22 = vpop.f32.mrb[11].mxu0  ;;  %493 = vst [vmem:[#allocation8 + $0x44] sm:$0xf] %v571_v26 }
 0x140   :  { %v568_v24 = vpack.c.bf16 %v321_v17, %v319_v12  ;;  %v325_v25 = vadd.f32 %v324_v22, %v825_v35 }
 0x142   :  { %490 = vst [vmem:[#allocation8 + $0x30] sm:$0xff] %v568_v24  ;;  %v570_v27 = vpack.c.bf16 %v325_v25, %v323_v21 }
 0x144   :  { %492 = vst [vmem:[#allocation8 + $0x3c] sm:$0xff] %v570_v27  ;;  %v328_v28 = vpop.f32.mrb[12].mxu0 }
 0x145   :  { %v329_v29 = vadd.f32 %v328_v28, %v823_v34  ;;  %v330_v30 = vpop.f32.mrb[13].mxu0 }
 0x146   :  { %v331_v31 = vadd.f32 %v330_v30, %v825_v35  ;;  %v332_v32 = vpop.f32.mrb[14].mxu0 }
 0x147   :  { %v333_v33 = vadd.f32 %v332_v32, %v823_v34  ;;  %v334_v36 = vpop.f32.mrb[15].mxu0 }
 0x148   :  { %v572_v37 = vpack.c.bf16 %v331_v31, %v329_v29  ;;  %v335_v38 = vadd.f32 %v334_v36, %v825_v35 }
 0x14a   :  { %494 = vst [vmem:[#allocation8 + $0x48] sm:$0xff] %v572_v37  ;;  %v574_v39 = vpack.c.bf16 %v335_v38, %v333_v33 }
 0x14c   :  { %496 = vst [vmem:[#allocation8 + $0x54] sm:$0xff] %v574_v39 }
 0x14d   :  { %734 = shalt.err (!%p731_p0)
}
 0x14e   :  { %s735_s30 = scalar_lea.hbm %s861_s3, 1536 }
 0x14f   :  { %p736_p1 = scmp.ne.s32.totalorder %s861_s3, %s735_s30  ;;  %p739_p2 = scmp.lt.u32.totalorder %s735_s30, %s861_s3 }
 0x151   :  { %p741_p3 = pnand %p739_p2, %p736_p1 }
 0x153   :  { %744 = shalt.err (!%p741_p3)
}
 0x154   :  { %509 = dma.vmem_to_hbm [thread:$0]  %s504_s26, 1536, %s861_s3, [#allocation4], %s752_s22, %s752_s22, %s753_s23  }
 0x155   :  { %749 = dma.done.wait [#allocation4], 1536  }
 0x156   :  { %750 = vsyncadd [#allocation4], 4294965760 }
 0x157   :  { %513 = vsyncpa [#allocation3], 1 }
 0x158   :  { %514 = vsyncpa [#allocation6], 1 }
 0x159   :  { %515 = vsyncpa [#allocation4], 1 }

</bundles_post_ra>
